<compile_context>
chip_gen: v7x
topology: tpu7x:2x2x1
jax: 0.10.0
libtpu: 0.0.40
codegen_flags: <defaults>
</compile_context>

<pallas_src>
import functools

import jax
import jax.numpy as jnp
from jax.experimental import pallas as pl
from jax.experimental.pallas import tpu as pltpu


def _ensemble_kernel(x_ref, wc_ref, bc_ref, wp_ref, bp_ref, o_ref):
    """One ensemble member per grid step; the whole batch per step.

    Block shapes seen by the kernel:
      x_ref : (B, Cin, HW)    input, HW flattened spatial on the lane axis
      wc_ref: (1, Cmax, Cin)  1x1-conv weight (zero padded rows for Ci < Cmax)
      bc_ref: (1, Cmax, 1)    conv bias (zero padded)
      wp_ref: (1, Cmax, Cout) Linear weight transposed (zero padded rows)
      bp_ref: (1, 1, Cout)    Linear bias
      o_ref : (1, B, Cout)
    """
    B, Cin, HW = x_ref.shape
    inv_hw = 1.0 / HW

    x = x_ref[...]                                   # (B, Cin, HW) f32
    wc = wc_ref[0]                                   # (Cmax, Cin)  f32

    # ---- Backbone stand-in: pointwise (1x1) conv over channels, HW lane-dense.
    if Cin <= 16:
        # Tiny contraction: Cin broadcast-FMAs on the VPU beat a K=Cin MXU pass.
        acc = x[:, 0:1, :] * wc[:, 0:1][None]        # (B, Cmax, HW)
        for i in range(1, Cin):
            acc = acc + x[:, i:i + 1, :] * wc[:, i:i + 1][None]
    else:
        # Large Cin: batched MXU matmul, bf16 operands, f32 accumulation.
        wc_b = jnp.broadcast_to(wc.astype(jnp.bfloat16)[None],
                                (B,) + wc.shape)     # (B, Cmax, Cin)
        acc = jnp.einsum("bci,bis->bcs", wc_b, x.astype(jnp.bfloat16),
                         preferred_element_type=jnp.float32)

    # Bias + ReLU in f32 (v5e VPU has no bf16 path).
    feat = jnp.maximum(acc + bc_ref[...], 0.0)       # (B, Cmax, HW)

    # Global average pool over the flattened spatial (lane) axis
    # == x.flatten(-2).mean(-1) in the PyTorch module.
    pooled = jnp.sum(feat, axis=-1) * inv_hw         # (B, Cmax) f32

    # Projection: nn.Linear(Ci, Cout). Padded rows of wp are zero, so the
    # padded channels contribute nothing. bf16 operands, f32 accumulate.
    proj = jnp.dot(pooled.astype(jnp.bfloat16),
                   wp_ref[0].astype(jnp.bfloat16),
                   preferred_element_type=jnp.float32)   # (B, Cout)
    o_ref[0] = (proj + bp_ref[0]).astype(o_ref.dtype)


def _stack_params(params, cmax):
    """Zero-pad each member's feature width to cmax and stack on a member axis."""
    wc, bc, wp, bp = [], [], [], []
    for p in params:
        ci = p["conv_w"].shape[0]
        pad = cmax - ci
        wc.append(jnp.pad(p["conv_w"], ((0, pad), (0, 0))))      # (cmax, Cin)
        bc.append(jnp.pad(p["conv_b"], (0, pad))[:, None])       # (cmax, 1)
        wp.append(jnp.pad(p["proj_w"].T, ((0, pad), (0, 0))))    # (cmax, Cout)
        bp.append(p["proj_b"][None, :])                          # (1, Cout)
    return jnp.stack(wc), jnp.stack(bc), jnp.stack(wp), jnp.stack(bp)


def ensemble_backbone_forward(x_nchw, params, return_dict=True):
    """Mirror of EnsembleBackbone.forward (global_pooling='avg').

    x_nchw : (B, Cin, H, W) float32 (PyTorch NCHW layout)
    params : list of dicts with keys
             name, conv_w (Ci, Cin), conv_b (Ci,), proj_w (Cout, Ci), proj_b (Cout,)
    """
    B, Cin, H, W = x_nchw.shape
    HW = H * W
    M = len(params)
    names = [p["name"] for p in params]
    Cout = params[0]["proj_w"].shape[0]

    # Common (8-aligned) padded feature width; weights stacked per member so a
    # single pallas_call handles the whole ensemble.
    cmax = max(p["conv_w"].shape[0] for p in params)
    cmax = ((cmax + 7) // 8) * 8
    wc_s, bc_s, wp_s, bp_s = _stack_params(params, cmax)

    # NCHW -> (B, Cin, H*W): pure reshape (no transpose pass); HW ends up on
    # the 128-wide lane axis inside the kernel.
    x_flat = x_nchw.reshape(B, Cin, HW)

    out = pl.pallas_call(
        _ensemble_kernel,
        out_shape=jax.ShapeDtypeStruct((M, B, Cout), jnp.float32),
        grid_spec=pltpu.PrefetchScalarGridSpec(
            num_scalar_prefetch=0,
            grid=(M,),                      # one grid step per ensemble member
            in_specs=[
                pl.BlockSpec((B, Cin, HW), lambda m: (0, 0, 0)),
                pl.BlockSpec((1, cmax, Cin), lambda m: (m, 0, 0)),
                pl.BlockSpec((1, cmax, 1), lambda m: (m, 0, 0)),
                pl.BlockSpec((1, cmax, Cout), lambda m: (m, 0, 0)),
                pl.BlockSpec((1, 1, Cout), lambda m: (m, 0, 0)),
            ],
            out_specs=pl.BlockSpec((1, B, Cout), lambda m: (m, 0, 0)),
        ),
        compiler_params=pltpu.CompilerParams(
            # Members are independent -> shardable across TensorCores (v7x).
            dimension_semantics=("parallel",)),
    )(x_flat, wc_s, bc_s, wp_s, bp_s)                # (M, B, Cout)

    if return_dict:
        return {name: out[i] for i, name in enumerate(names)}
    # StackLayer(dim=1): (B, num_backbones, Cout)
    return jnp.transpose(out, (1, 0, 2))


def _init_params(key, in_channels, member_channels, out_channels):
    params = []
    for i, ci in enumerate(member_channels):
        key, k1, k2, k3, k4 = jax.random.split(key, 5)
        params.append({
            "name": f"backbone_{i}",
            # 1x1 conv weight in PyTorch (out, in) layout.
            "conv_w": 0.1 * jax.random.normal(k1, (ci, in_channels), jnp.float32),
            "conv_b": 0.1 * jax.random.normal(k2, (ci,), jnp.float32),
            # nn.Linear(ci, out_channels): weight (out, in), bias (out,).
            "proj_w": 0.1 * jax.random.normal(k3, (out_channels, ci), jnp.float32),
            "proj_b": 0.1 * jax.random.normal(k4, (out_channels,), jnp.float32),
        })
    return params


def _reference(x_nchw, params):
    """Pure-JAX f32 reference for correctness check."""
    B, Cin, H, W = x_nchw.shape
    x = x_nchw.reshape(B, Cin, H * W)
    out = {}
    for p in params:
        feat = jnp.einsum("ci,bis->bcs", p["conv_w"], x)
        feat = jnp.maximum(feat + p["conv_b"][None, :, None], 0.0)
        pooled = feat.mean(axis=-1)                               # (B, Ci)
        out[p["name"]] = pooled @ p["proj_w"].T + p["proj_b"]     # (B, Cout)
    return out


if __name__ == "__main__":
    key = jax.random.PRNGKey(0)
    B, Cin, H, Wd = 2, 4, 16, 16
    out_channels = 32
    member_channels = [32, 64]   # two "backbones" with different feature widths

    key, kx = jax.random.split(key)
    x = jax.random.normal(kx, (B, Cin, H, Wd), jnp.float32)   # NCHW, like PyTorch

    params = _init_params(key, Cin, member_channels, out_channels)

    fwd = jax.jit(functools.partial(ensemble_backbone_forward, params=params))
    out = fwd(x)
    out = jax.tree_util.tree_map(jax.block_until_ready, out)

    ref = _reference(x, params)
    for name in out:
        assert out[name].shape == (B, out_channels), out[name].shape
        assert jnp.allclose(out[name], ref[name], rtol=2e-2, atol=2e-2), name

    print("KERNEL_OK")
</pallas_src>

<mosaic_0001>
module attributes {stable_mosaic.version = 11 : i64} {
  func.func @_ensemble_kernel(%arg0: i32, %arg1: memref<2x4x256xf32, #tpu.memory_space<vmem>>, %arg2: memref<1x64x4xf32, #tpu.memory_space<vmem>>, %arg3: memref<1x64x1xf32, #tpu.memory_space<vmem>>, %arg4: memref<1x64x32xf32, #tpu.memory_space<vmem>>, %arg5: memref<1x1x32xf32, #tpu.memory_space<vmem>>, %arg6: memref<1x2x32xf32, #tpu.memory_space<vmem>>) attributes {dimension_semantics = [#tpu.dimension_semantics<parallel>], iteration_bounds = array<i64: 2>, scalar_prefetch = 0 : i64, scratch_operands = 0 : i64, tpu.core_type = #tpu.core_type<tc>, window_params = [{pipeline_mode = #tpu.pipeline_mode<synchronous>, transform_indices = @transform_0, window_bounds = array<i64: 2, 4, 256>}, {transform_indices = @transform_1, window_bounds = array<i64: 1, 64, 4>}, {transform_indices = @transform_2, window_bounds = array<i64: 1, 64, 1>}, {transform_indices = @transform_3, window_bounds = array<i64: 1, 64, 32>}, {transform_indices = @transform_4, window_bounds = array<i64: 1, 1, 32>}, {transform_indices = @transform_5, window_bounds = array<i64: 1, 2, 32>}]} {
    %c0 = arith.constant 0 : index
    %c0_0 = arith.constant 0 : index
    %c0_1 = arith.constant 0 : index
    %0 = vector.load %arg1[%c0, %c0_0, %c0_1] : memref<2x4x256xf32, #tpu.memory_space<vmem>>, vector<2x4x256xf32>
    %c0_2 = arith.constant 0 : index
    %c0_3 = arith.constant 0 : index
    %c0_4 = arith.constant 0 : index
    %1 = vector.load %arg2[%c0_2, %c0_3, %c0_4] : memref<1x64x4xf32, #tpu.memory_space<vmem>>, vector<1x64x4xf32>
    %2 = vector.shape_cast %1 : vector<1x64x4xf32> to vector<64x4xf32>
    %3 = vector.extract_strided_slice %0 {offsets = [0, 0, 0], sizes = [2, 1, 256], strides = [1, 1, 1]} : vector<2x4x256xf32> to vector<2x1x256xf32>
    %4 = vector.extract_strided_slice %2 {offsets = [0, 0], sizes = [64, 1], strides = [1, 1]} : vector<64x4xf32> to vector<64x1xf32>
    %5 = vector.shape_cast %4 : vector<64x1xf32> to vector<1x64x1xf32>
    %6 = vector.broadcast %3 : vector<2x1x256xf32> to vector<2x64x256xf32>
    %7 = vector.broadcast %5 : vector<1x64x1xf32> to vector<2x64x256xf32>
    %8 = arith.mulf %6, %7 : vector<2x64x256xf32>
    %9 = vector.extract_strided_slice %0 {offsets = [0, 1, 0], sizes = [2, 1, 256], strides = [1, 1, 1]} : vector<2x4x256xf32> to vector<2x1x256xf32>
    %10 = vector.extract_strided_slice %2 {offsets = [0, 1], sizes = [64, 1], strides = [1, 1]} : vector<64x4xf32> to vector<64x1xf32>
    %11 = vector.shape_cast %10 : vector<64x1xf32> to vector<1x64x1xf32>
    %12 = vector.broadcast %9 : vector<2x1x256xf32> to vector<2x64x256xf32>
    %13 = vector.broadcast %11 : vector<1x64x1xf32> to vector<2x64x256xf32>
    %14 = arith.mulf %12, %13 : vector<2x64x256xf32>
    %15 = arith.addf %8, %14 : vector<2x64x256xf32>
    %16 = vector.extract_strided_slice %0 {offsets = [0, 2, 0], sizes = [2, 1, 256], strides = [1, 1, 1]} : vector<2x4x256xf32> to vector<2x1x256xf32>
    %17 = vector.extract_strided_slice %2 {offsets = [0, 2], sizes = [64, 1], strides = [1, 1]} : vector<64x4xf32> to vector<64x1xf32>
    %18 = vector.shape_cast %17 : vector<64x1xf32> to vector<1x64x1xf32>
    %19 = vector.broadcast %16 : vector<2x1x256xf32> to vector<2x64x256xf32>
    %20 = vector.broadcast %18 : vector<1x64x1xf32> to vector<2x64x256xf32>
    %21 = arith.mulf %19, %20 : vector<2x64x256xf32>
    %22 = arith.addf %15, %21 : vector<2x64x256xf32>
    %23 = vector.extract_strided_slice %0 {offsets = [0, 3, 0], sizes = [2, 1, 256], strides = [1, 1, 1]} : vector<2x4x256xf32> to vector<2x1x256xf32>
    %24 = vector.extract_strided_slice %2 {offsets = [0, 3], sizes = [64, 1], strides = [1, 1]} : vector<64x4xf32> to vector<64x1xf32>
    %25 = vector.shape_cast %24 : vector<64x1xf32> to vector<1x64x1xf32>
    %26 = vector.broadcast %23 : vector<2x1x256xf32> to vector<2x64x256xf32>
    %27 = vector.broadcast %25 : vector<1x64x1xf32> to vector<2x64x256xf32>
    %28 = arith.mulf %26, %27 : vector<2x64x256xf32>
    %29 = arith.addf %22, %28 : vector<2x64x256xf32>
    %c0_5 = arith.constant 0 : index
    %c0_6 = arith.constant 0 : index
    %c0_7 = arith.constant 0 : index
    %30 = vector.load %arg3[%c0_5, %c0_6, %c0_7] : memref<1x64x1xf32, #tpu.memory_space<vmem>>, vector<1x64x1xf32>
    %31 = vector.broadcast %30 : vector<1x64x1xf32> to vector<2x64x256xf32>
    %32 = arith.addf %29, %31 : vector<2x64x256xf32>
    %cst = arith.constant 0.000000e+00 : f32
    %33 = vector.broadcast %cst : f32 to vector<2x64x256xf32>
    %34 = arith.maximumf %32, %33 : vector<2x64x256xf32>
    %cst_8 = arith.constant dense<0.000000e+00> : vector<2x64xf32>
    %35 = vector.multi_reduction <add>, %34, %cst_8 [2] : vector<2x64x256xf32> to vector<2x64xf32>
    %cst_9 = arith.constant 3.906250e-03 : f32
    %36 = vector.broadcast %cst_9 : f32 to vector<2x64xf32>
    %37 = arith.mulf %35, %36 : vector<2x64xf32>
    %38 = arith.truncf %37 : vector<2x64xf32> to vector<2x64xbf16>
    %c0_10 = arith.constant 0 : index
    %c0_11 = arith.constant 0 : index
    %c0_12 = arith.constant 0 : index
    %39 = vector.load %arg4[%c0_10, %c0_11, %c0_12] : memref<1x64x32xf32, #tpu.memory_space<vmem>>, vector<1x64x32xf32>
    %40 = vector.shape_cast %39 : vector<1x64x32xf32> to vector<64x32xf32>
    %41 = arith.truncf %40 : vector<64x32xf32> to vector<64x32xbf16>
    %cst_13 = arith.constant dense<0.000000e+00> : vector<2x32xf32>
    %42 = tpu.matmul %38, %41, %cst_13 {dimension_numbers = #tpu.dot_dimension_numbers<[1], [0], [0], [1], [0, 0, 1, 1], [], []>} : vector<2x64xbf16>, vector<64x32xbf16>, vector<2x32xf32> -> vector<2x32xf32>
    %c0_14 = arith.constant 0 : index
    %c0_15 = arith.constant 0 : index
    %c0_16 = arith.constant 0 : index
    %43 = vector.load %arg5[%c0_14, %c0_15, %c0_16] : memref<1x1x32xf32, #tpu.memory_space<vmem>>, vector<1x1x32xf32>
    %44 = vector.shape_cast %43 : vector<1x1x32xf32> to vector<1x32xf32>
    %45 = vector.broadcast %44 : vector<1x32xf32> to vector<2x32xf32>
    %46 = arith.addf %42, %45 : vector<2x32xf32>
    %c0_17 = arith.constant 0 : index
    %c0_18 = arith.constant 0 : index
    %c0_19 = arith.constant 0 : index
    %47 = vector.load %arg6[%c0_17, %c0_18, %c0_19] : memref<1x2x32xf32, #tpu.memory_space<vmem>>, vector<1x2x32xf32>
    %48 = vector.shape_cast %47 : vector<1x2x32xf32> to vector<2x32xf32>
    %49 = vector.shape_cast %46 : vector<2x32xf32> to vector<1x2x32xf32>
    tpu.vector_store %arg6[%c0_17, %c0_18, %c0_19], %49 {strides = array<i32>} : memref<1x2x32xf32, #tpu.memory_space<vmem>>, vector<1x2x32xf32>,
    return
  }
  func.func @transform_0(%arg0: i32) -> (i32, i32, i32) {
    %c0_i32 = arith.constant 0 : i32
    %c0_i32_0 = arith.constant 0 : i32
    %c0_i32_1 = arith.constant 0 : i32
    %c0_i32_2 = arith.constant 0 : i32
    return %c0_i32, %c0_i32_0, %c0_i32_1 : i32, i32, i32
  }
  func.func @transform_1(%arg0: i32) -> (i32, i32, i32) {
    %c0_i32 = arith.constant 0 : i32
    %c0_i32_0 = arith.constant 0 : i32
    %c0_i32_1 = arith.constant 0 : i32
    return %arg0, %c0_i32, %c0_i32_0 : i32, i32, i32
  }
  func.func @transform_2(%arg0: i32) -> (i32, i32, i32) {
    %c0_i32 = arith.constant 0 : i32
    %c0_i32_0 = arith.constant 0 : i32
    %c0_i32_1 = arith.constant 0 : i32
    return %arg0, %c0_i32, %c0_i32_0 : i32, i32, i32
  }
  func.func @transform_3(%arg0: i32) -> (i32, i32, i32) {
    %c0_i32 = arith.constant 0 : i32
    %c0_i32_0 = arith.constant 0 : i32
    %c0_i32_1 = arith.constant 0 : i32
    return %arg0, %c0_i32, %c0_i32_0 : i32, i32, i32
  }
  func.func @transform_4(%arg0: i32) -> (i32, i32, i32) {
    %c0_i32 = arith.constant 0 : i32
    %c0_i32_0 = arith.constant 0 : i32
    %c0_i32_1 = arith.constant 0 : i32
    return %arg0, %c0_i32, %c0_i32_0 : i32, i32, i32
  }
  func.func @transform_5(%arg0: i32) -> (i32, i32, i32) {
    %c0_i32 = arith.constant 0 : i32
    %c0_i32_0 = arith.constant 0 : i32
    %c0_i32_1 = arith.constant 0 : i32
    return %arg0, %c0_i32, %c0_i32_0 : i32, i32, i32
  }
}

</mosaic_0001>

<bundles_post_ra>
// kernel: ensemble_backbone_forward.1
= control target key start
LH: loop header
LB: loop body
LE: loop exit
PB: predicated region body
PF: predicated region fallthrough
CT: control target
= control target key end

     0   :  { %10 = vsyncpa [#allocation3], 0  ;;  %s2211_s0 = inlined_call_operand.vmem [shape: f32[2,4,256], index: 0, kind: input, shape index: {}]   ;;  %s2212_s1 = inlined_call_operand.hbm [shape: f32[2,64,4], index: 1, kind: input, shape index: {}]   ;;  %s2213_s2 = inlined_call_operand.hbm [shape: f32[2,64,1], index: 2, kind: input, shape index: {}]   ;;  %s2214_s3 = inlined_call_operand.vmem [shape: f32[2,64,32], index: 3, kind: input, shape index: {}]   ;;  %s2215_s4 = inlined_call_operand.vmem [shape: f32[2,1,32], index: 4, kind: input, shape index: {}]   ;;  %s2216_s5 = inlined_call_operand.vmem [shape: f32[2,2,32], index: 5, kind: output, shape index: {}]  }
   0x1   :  { %12 = vsyncpa [#allocation3 + $0x1], 0 }
   0x2   :  { %13 = vsyncpa [#allocation5], 0 }
   0x3   :  { %15 = vsyncpa [#allocation5 + $0x1], 0  ;;  %s1565_s18 = smov 0   ;;  %s1567_s19 = smov 0  }
   0x4   :  { %s1569_s20 = smov 0   ;;  %s1571_s21 = smov 0  }
   0x5 LB: > { %s1584_s22 = sadd.s32 4294967295, %s1523_s21   ;;  %s1587_s23 = sadd.s32 1, %s1523_s21   ;;  %s1523_s21 = sphi %s1571_s21, %s2267_s21   ;;  %s1519_s20 = sphi %s1569_s20, %s2266_s20   ;;  %s1515_s19 = sphi %s1567_s19, %s2265_s19   ;;  %s1511_s18 = sphi %s1565_s18, %s2264_s18  }
   0x6   : > { %s46_s24 = ssub.s32 %s1523_s21, %s1587_s23  ;;  %s49_s25 = sadd.s32 1, %s1519_s20 }
   0x7   : > { %p47_p0 = scmp.eq.s32.totalorder %s46_s24, 0  ;;  %p56_p1 = scmp.ne.s32.totalorder %s1519_s20, %s1515_s19 }
   0x8   : > { %p57_p2 = scmp.eq.s32.totalorder %s1523_s21, 0  ;;  %p62_p3 = scmp.ne.s32.totalorder %s1515_s19, %s1511_s18 }
   0x9   : > { %s1597_s26 = scalar_select %p47_p0, %s1519_s20, %s49_s25  }
   0xa   : > { %p58_p4 = por %p57_p2, %p56_p1  ;;  %p63_p5 = scmp.eq.s32.totalorder %s1584_s22, 0 }
   0xb   : > { %p1363_p6 = scmp.lt.s32.totalorder %s1523_s21, 2  ;;  %s1606_s28 = sand.u32 1, %s1519_s20  }
   0xc   : > { %p1601_p7 = por %p63_p5, %p62_p3  ;;  %s1316_s29 = sshll.u32 %s1606_s28, 6 }
   0xd   : > { %s1332_s30 = sshll.u32 %s1523_s21, 10  ;;  %s197_s9 = scalar_lea.vmem [#allocation2], %s1316_s29 }
   0xe   : > { %s2226_s27 = scalar_select %p1601_p7, 1, 0 }
   0xf   : > { %s1615_s8 = scalar_lea.hbm %s2212_s1, %s1332_s30  ;;  %s204_s10 = sshll.u32 %s197_s9, 4  ;;  %s1619_s10 = int_to_ptr.vmem [resolvable:$true] %s204_s10 }
  0x10   : > { %p1621_p8 = pnand %p1363_p6, %p58_p4  ;;  %s194_s12 = scalar_lea.sflag [#allocation3], %s1606_s28 }
  0x11   : > { %s1425_s13 = scalar_lea.hbm %s1615_s8, 1024  ;;  %s1430_s16 = scalar_lea.hbm %s2212_s1, 2048 }
  0x12   : > { %p1426_p10 = scmp.ne.s32.totalorder %s1615_s8, %s1425_s13  ;;  %p1427_p11 = pneg %p1621_p8 }
  0x13   : > { %p1431_p0 = scmp.lt.u32.totalorder %s1615_s8, %s2212_s1  ;;  %p1432_p1 = scmp.lt.u32.totalorder %s1430_s16, %s1425_s13 }
  0x14   : > { %p1428_p12 = pnand %p1427_p11, %p1426_p10  ;;  %p1434_p3 = scmp.lt.u32.totalorder %s1425_s13, %s1615_s8 }
  0x15   : > { %p1433_p2 = por %p1432_p1, %p1431_p0 }
  0x16   : > { %p1429_p13 = pneg %p1428_p12 }
  0x17   : > { %p1435_p4 = por %p1434_p3, %p1433_p2 }
  0x19   : > { %p1436_p5 = pnand %p1435_p4, %p1429_p13 }
  0x1b   : > { %1439 = shalt.err (!%p1436_p5)
}
  0x1c   : > { %s1440_s24 = scalar_lea.vmem %s1619_s10, 1024  ;;  %s1525_s25 = smov [#allocation2]  }
  0x1d   : > { %p1441_p6 = scmp.ne.s32.totalorder %s1619_s10, %s1440_s24  ;;  %s1445_s6 = sshll.u32 %s1525_s25, 4  ;;  %s1446_s6 = int_to_ptr.vmem [resolvable:$false] %s1445_s6 }
  0x1e   : > { %s1447_s7 = scalar_lea.vmem %s1446_s6, 2048  ;;  %p1448_p9 = scmp.lt.s32.totalorder %s1619_s10, %s1446_s6 }
  0x1f   : > { %p1443_p10 = pnand %p1441_p6, %p1427_p11  ;;  %p1449_p0 = scmp.lt.s32.totalorder %s1447_s7, %s1440_s24 }
  0x21   : > { %p1444_p12 = pneg %p1443_p10  ;;  %p1450_p1 = por %p1449_p0, %p1448_p9 }
  0x23   : > { %p1451_p2 = pnand %p1450_p1, %p1444_p12 }
  0x25   : > { %1454 = shalt.err (!%p1451_p2)
}
  0x26   : > { %s1526_s9 = smov 128   ;;  %s1527_s13 = smov 8  }
  0x27   : > { %1359 = dma.hbm_to_vmem [thread:$0]  (!%p1621_p8), %s1615_s8, 1024, %s1619_s10, %s194_s12, %s1526_s9, %s1526_s9, %s1527_s13  }
  0x28   : > { %p247_p9 = scmp.lt.s32.totalorder %s1523_s21, 3  ;;  %s1663_s16 = scalar_lea.hbm %s2213_s2, %s1332_s30 }
  0x29   : > { %p2228_p13 = scmp.ge.s32.totalorder %s1523_s21, 1  ;;  %s218_s18 = scalar_lea.vmem [#allocation4], %s1316_s29 }
  0x2a   : > { %s225_s24 = sshll.u32 %s218_s18, 4  ;;  %s215_s8 = scalar_lea.sflag [#allocation5], %s1606_s28  ;;  %s1673_s24 = int_to_ptr.vmem [resolvable:$true] %s225_s24 }
  0x2b   : > { %p1667_p3 = pnand %p2228_p13, %p247_p9  ;;  %s1455_s10 = scalar_lea.hbm %s1663_s16, 1024 }
  0x2c   : > { %p1456_p4 = scmp.ne.s32.totalorder %s1663_s16, %s1455_s10  ;;  %s1460_s12 = scalar_lea.hbm %s2213_s2, 2048 }
  0x2d   : > { %p1461_p10 = scmp.lt.u32.totalorder %s1663_s16, %s2213_s2  ;;  %p1462_p12 = scmp.lt.u32.totalorder %s1460_s12, %s1455_s10 }
  0x2e   : > { %p1458_p5 = pnand %p1456_p4, %p1427_p11  ;;  %p1464_p1 = scmp.lt.u32.totalorder %s1455_s10, %s1663_s16 }
  0x2f   : > { %p1463_p0 = por %p1462_p12, %p1461_p10 }
  0x30   : > { %p1459_p6 = pneg %p1458_p5 }
  0x31   : > { %p1465_p2 = por %p1464_p1, %p1463_p0 }
  0x33   : > { %p1466_p9 = pnand %p1465_p2, %p1459_p6 }
  0x35   : > { %1469 = shalt.err (!%p1466_p9)
}
  0x36   : > { %s1470_s29 = scalar_lea.vmem %s1673_s24, 1024  ;;  %s1528_s7 = smov [#allocation4]  }
  0x37   : > { %p1471_p13 = scmp.ne.s32.totalorder %s1673_s24, %s1470_s29  ;;  %s1475_s14 = sshll.u32 %s1528_s7, 4  ;;  %s1476_s14 = int_to_ptr.vmem [resolvable:$false] %s1475_s14 }
  0x38   : > { %s1477_s15 = scalar_lea.vmem %s1476_s14, 2048  ;;  %p1478_p7 = scmp.lt.s32.totalorder %s1673_s24, %s1476_s14 }
  0x39   : > { %p1473_p4 = pnand %p1471_p13, %p1427_p11  ;;  %p1479_p10 = scmp.lt.s32.totalorder %s1477_s15, %s1470_s29 }
  0x3b   : > { %p1474_p5 = pneg %p1473_p4  ;;  %p1480_p12 = por %p1479_p10, %p1478_p7 }
  0x3d   : > { %p1481_p0 = pnand %p1480_p12, %p1474_p5 }
  0x3f   : > { %1484 = shalt.err (!%p1481_p0)
}
  0x40   : > { %1362 = dma.hbm_to_vmem [thread:$0]  (!%p1621_p8), %s1663_s16, 1024, %s1673_s24, %s215_s8, %s1526_s9, %s1526_s9, %s1527_s13  }
  0x41   : > { %251 = sbr.rel (%p1667_p3) target bundleno = 708 (0x2c4), region = 40 }
  0x48   : > { %s253_s18 = sand.u32 1, %s1515_s19   ;;  %p2230_p7 = scmp.ne.s32.totalorder %s2226_s27, 0 }
  0x49   : > { %s1323_s10 = sshll.u32 %s253_s18, 6  ;;  %s254_s21 = scalar_lea.sflag [#allocation3], %s253_s18 }
  0x4a   : > { %s1707_s30 = scalar_lea.vmem [#allocation2], %s1323_s10 }
  0x4b   : > { %1502 = dma.done.wait (%p2230_p7), %s254_s21, 1024  }
  0x4c   : > { %1504 = vsyncadd (%p2230_p7), %s254_s21, 4294966272  ;;  %s263_s28 = scalar_lea.sflag [#allocation5], %s253_s18  ;;  %s1713_s11 = scalar_lea.vmem [#allocation4], %s1323_s10 }
  0x4d   : > { %1506 = dma.done.wait (%p2230_p7), %s263_s28, 1024  }
  0x4e   : > { %1508 = vsyncadd (%p2230_p7), %s263_s28, 4294966272  ;;  %v1529_v0 = vmov 1   ;;  %v322_v1 = vld [vmem:[%s1707_s30 + $0x10] sm:$0xff]  ;;  %v320_v2 = vld [vmem:[%s1707_s30] sm:$0xff]  ;;  %v1530_v7 = vmov 0   ;;  %v1531_v8 = vmov 2   ;;  %v2218_v20 = vlaneseq }
  0x4f   : > { %1406 = vset.pattern.permute.xlu0 %v1529_v0  ;;  %1404 = vset.pattern.permute.xlu1 %v1529_v0  ;;  %v324_v3 = vld [vmem:[%s1707_s30 + $0x20] sm:$0xff]  ;;  %v321_v4 = vld [vmem:[%s1707_s30 + $0x8] sm:$0xff]  ;;  %v327_v5 = vld [vmem:[%s1707_s30 + $0x38] sm:$0xff]  ;;  %v1532_v9 = vmov 3   ;;  %p305_p8 = scmp.lt.s32.totalorder %s1584_s22, 1  ;;  %vm1534_vm0 = vmmov 0  }
  0x50   : > { %483 = vperm.xlu0 %1406, %v322_v1   ;;  %475 = vperm.xlu1 %1404, %v320_v2   ;;  %v323_v6 = vld [vmem:[%s1707_s30 + $0x18] sm:$0xff]  ;;  %v325_v10 = vld [vmem:[%s1707_s30 + $0x28] sm:$0xff]  ;;  %v326_v11 = vld [vmem:[%s1707_s30 + $0x30] sm:$0xff]  ;;  %v1736_v21 = vshrl.u32 %v2218_v20, 7  ;;  %vm1072_vm1 = vcmask 130112   ;;  %vm1079_vm2 = vcmask 195712  }
  0x51   : > { %v834_v12 = vld [vmem:[%s1713_s11] sm:$0xff]  ;;  %v841_v14 = vld [vmem:[%s1713_s11 + $0x38] sm:$0xff]  ;;  %v835_v15 = vld [vmem:[%s1713_s11 + $0x8] sm:$0xff]  ;;  %s2269_s22 = smov (!%p305_p8, %s1584_s22), 1  ;;  %vm1086_vm3 = vcmask 261312   ;;  %vm1093_vm4 = vcmask 326912  }
  0x52   : > { %v838_v13 = vld [vmem:[%s1713_s11 + $0x20] sm:$0xff]  ;;  %v836_v16 = vld [vmem:[%s1713_s11 + $0x10] sm:$0xff]  ;;  %v837_v17 = vld [vmem:[%s1713_s11 + $0x18] sm:$0xff]  ;;  %2231 = vst [vmem:[#allocation8_spill] sm:$0xff] %v1736_v21  ;;  %v440_v22 = vsub.s32 1, %v1736_v21  ;;  %v444_v23 = vsub.s32 5, %v1736_v21  ;;  %s312_s29 = scalar_lea.vmem %s2215_s4, %s2269_s22 }
  0x53   : > { %v839_v18 = vld [vmem:[%s1713_s11 + $0x28] sm:$0xff]  ;;  %v840_v19 = vld [vmem:[%s1713_s11 + $0x30] sm:$0xff]  ;;  %v1745_v25 = vld [vmem:[%s2211_s0] sm:$0xff]  ;;  %v332_v27 = vsub.s32 0, %v1736_v21  ;;  %v336_v28 = vsub.s32 4, %v1736_v21  ;;  %v572_v33 = vsub.s32 2, %v1736_v21 }
  0x54   : > { %491 = vperm.xlu0 %1406, %v324_v3   ;;  %479 = vperm.xlu1 %1404, %v321_v4   ;;  %v441_v29 = vrot.slane %v1745_v25, %v440_v22  ;;  %v445_v30 = vrot.slane %v1745_v25, %v444_v23  ;;  %v576_v34 = vsub.s32 6, %v1736_v21  ;;  %v1760_v35 = vld [vmem:[%s2211_s0 + $0x8] sm:$0xff]  ;;  %s1334_s17 = sshll.u32 %s2269_s22, 6  ;;  %vm1100_vm5 = vcmask 392512   ;;  %s1327_s7 = sshll.u32 %s2269_s22, 1 }
  0x55   : > { %v333_v36 = vrot.slane %v1745_v25, %v332_v27  ;;  %v337_v37 = vrot.slane %v1745_v25, %v336_v28  ;;  %v341_v38 = vrot.slane %v1760_v35, %v332_v27  ;;  %v345_v39 = vrot.slane %v1760_v35, %v336_v28  ;;  %s309_s12 = scalar_lea.vmem %s2214_s3, %s1334_s17  ;;  %s316_s18 = scalar_lea.vmem %s2216_s5, %s1327_s7 }
  0x56   : > { %v1766_v40 = vrot.slane %v441_v29, %v440_v22  ;;  %v1768_v41 = vrot.slane %v445_v30, %v440_v22  ;;  %v449_v42 = vrot.slane %v1760_v35, %v440_v22  ;;  %v453_v43 = vrot.slane %v1760_v35, %v444_v23 }
  0x57   : > { %v573_v45 = vrot.slane %v1745_v25, %v572_v33  ;;  %v577_v46 = vrot.slane %v1745_v25, %v576_v34  ;;  %v581_v50 = vrot.slane %v1760_v35, %v572_v33  ;;  %v585_v51 = vrot.slane %v1760_v35, %v576_v34 }
  0x58   : > { %503 = vperm.xlu0 %1406, %v327_v5   ;;  %1405 = vset.pattern.permute.xlu1 %v1530_v7  ;;  %v1786_v52 = vrot.slane %v333_v36, %v332_v27  ;;  %v1788_v53 = vrot.slane %v337_v37, %v332_v27  ;;  %v1790_v54 = vrot.slane %v341_v38, %v332_v27  ;;  %vm1107_vm6 = vcmask 458112  }
  0x59   : > { %383 = vperm.xlu1 %1405, %v323_v6   ;;  %v1792_v55 = vrot.slane %v345_v39, %v332_v27  ;;  %v1794_v56 = vrot.slane %v449_v42, %v440_v22  ;;  %v1796_v57 = vrot.slane %v453_v43, %v440_v22  ;;  %v1800_v59 = vrot.slane %v573_v45, %v572_v33 }
  0x5a   : > { %v1802_v60 = vrot.slane %v577_v46, %v572_v33  ;;  %v1804_v61 = vrot.slane %v581_v50, %v572_v33  ;;  %v1806_v62 = vrot.slane %v585_v51, %v572_v33  ;;  %v704_v45 = vsub.s32 3, %v1736_v21 }
  0x5b   : > { %v708_v46 = vsub.s32 7, %v1736_v21  ;;  %vm1114_vm7 = vcmask 523712   ;;  %vm1155_vm8 = vcmask 1041409   ;;  %vm1158_vm9 = vcmask 523264  }
  0x5c   : > { %1415 = vset.pattern.permute.xlu0 %v1531_v8  ;;  %vm1202_vm10 = vcmask 254976  }
  0x5d   : > { %611 = vperm.xlu0 %1415, %v321_v4   ;;  %1407 = vset.pattern.permute.xlu1 %v1529_v0 }
  0x5e   : > { %487 = vperm.xlu1 %1407, %v323_v6  }
  0x61   : > { %619 = vperm.xlu0 %1415, %v323_v6  }
  0x62   : > { %1408 = vset.pattern.permute.xlu1 %v1531_v8 }
  0x63   : > { %607 = vperm.xlu1 %1408, %v320_v2  }
  0x65   : > { %635 = vperm.xlu0 %1415, %v327_v5  }
  0x67   : > { %1409 = vset.pattern.permute.xlu1 %v1530_v7 }
  0x68   : > { %388 = vperm.xlu1 %1409, %v324_v3  }
  0x69   : > { %1419 = vset.pattern.permute.xlu0 %v1532_v9 }
  0x6a   : > { %747 = vperm.xlu0 %1419, %v322_v1  }
  0x6c   : > { %393 = vperm.xlu1 %1409, %v325_v10  }
  0x6e   : > { %767 = vperm.xlu0 %1419, %v327_v5  }
  0x70   : > { %1410 = vset.pattern.permute.xlu1 %v1529_v0 }
  0x71   : > { %495 = vperm.xlu1 %1410, %v325_v10  }
  0x72   : > { %1423 = vset.pattern.permute.xlu0 %v1530_v7 }
  0x73   : > { %368 = vperm.xlu0 %1423, %v320_v2  }
  0x75   : > { %1411 = vset.pattern.permute.xlu1 %v1531_v8 }
  0x76   : > { %615 = vperm.xlu1 %1411, %v322_v1  }
  0x77   : > { %373 = vperm.xlu0 %1423, %v321_v4  }
  0x7a   : > { %1412 = vset.pattern.permute.xlu1 %v1532_v9 }
  0x7b   : > { %378 = vperm.xlu0 %1423, %v322_v1   ;;  %739 = vperm.xlu1 %1412, %v320_v2  }
  0x7f   : > { %398 = vperm.xlu0 %1423, %v326_v11   ;;  %743 = vperm.xlu1 %1412, %v321_v4  }
  0x83   : > { %844 = vperm.xlu0 %1423, %v834_v12   ;;  %1413 = vset.pattern.permute.xlu1 %v1530_v7 }
  0x84   : > { %403 = vperm.xlu1 %1413, %v327_v5  }
  0x87   : > { %864 = vperm.xlu0 %1423, %v838_v13  }
  0x88   : > { %1414 = vset.pattern.permute.xlu1 %v1529_v0 }
  0x89   : > { %499 = vperm.xlu1 %1414, %v326_v11  }
  0x8b   : > { %879 = vperm.xlu0 %1423, %v841_v14  }
  0x8d   : > { %1416 = vset.pattern.permute.xlu1 %v1531_v8 }
  0x8e   : > { %623 = vperm.xlu1 %1416, %v324_v3  }
  0x92   : > { %627 = vperm.xlu1 %1416, %v325_v10  }
  0x96   : > { %1417 = vset.pattern.permute.xlu1 %v1532_v9 }
  0x97   : > { %751 = vperm.xlu1 %1417, %v323_v6  }
  0x9b   : > { %1418 = vset.pattern.permute.xlu1 %v1531_v8 }
  0x9c   : > { %631 = vperm.xlu1 %1418, %v326_v11  }
  0xa0   : > { %1420 = vset.pattern.permute.xlu1 %v1532_v9 }
  0xa1   : > { %755 = vperm.xlu1 %1420, %v324_v3  }
  0xa5   : > { %759 = vperm.xlu1 %1420, %v325_v10  }
  0xa9   : > { %1421 = vset.pattern.permute.xlu1 %v1530_v7 }
  0xaa   : > { %849 = vperm.xlu1 %1421, %v835_v15  }
  0xae   : > { %1422 = vset.pattern.permute.xlu1 %v1532_v9 }
  0xaf   : > { %763 = vperm.xlu1 %1422, %v326_v11  }
  0xb3   : > { %1424 = vset.pattern.permute.xlu1 %v1530_v7 }
  0xb4   : > { %854 = vperm.xlu1 %1424, %v836_v16  }
  0xb8   : > { %859 = vperm.xlu1 %1424, %v837_v17  }
  0xbc   : > { %869 = vperm.xlu1 %1424, %v839_v18  }
  0xc0   : > { %874 = vperm.xlu1 %1424, %v840_v19  }
  0xcf   : > { %v1740_v24 = vpop.permute.xlu1 %475  ;;  %v1747_v26 = vpop.permute.xlu0 %483 }
  0xd3   : > { %v1753_v31 = vpop.permute.xlu1 %479  ;;  %v492_v32 = vpop.permute.xlu0 %491 }
  0xd4   : > { %v514_v30 = vmul.f32 %v492_v32, %v1766_v40  ;;  %v515_v33 = vmul.f32 %v492_v32, %v1768_v41  ;;  %v530_v34 = vmul.f32 %v492_v32, %v1794_v56  ;;  %v531_v36 = vmul.f32 %v492_v32, %v1796_v57 }
  0xd7   : > { %v1772_v44 = vpop.permute.xlu0 %503 }
  0xd8   : > { %v1778_v47 = vmul.f32 %v1772_v44, %v1766_v40  ;;  %v1782_v48 = vmul.f32 %v1772_v44, %v1768_v41  ;;  %v384_v49 = vpop.permute.xlu1 %383 }
  0xd9   : > { %v412_v63 = vmul.f32 %v384_v49, %v1786_v52  ;;  %v413_v0 = vmul.f32 %v384_v49, %v1788_v53  ;;  %v428_v1 = vmul.f32 %v384_v49, %v1790_v54  ;;  %v429_v2 = vmul.f32 %v384_v49, %v1792_v55 }
  0xdc   : > { %v1798_v58 = vpop.permute.xlu0 %611 }
  0xdd   : > { %v488_v3 = vpop.permute.xlu1 %487 }
  0xde   : > { %v512_v4 = vmul.f32 %v488_v3, %v1766_v40  ;;  %v513_v5 = vmul.f32 %v488_v3, %v1768_v41  ;;  %v528_v6 = vmul.f32 %v488_v3, %v1794_v56  ;;  %v529_v7 = vmul.f32 %v488_v3, %v1796_v57 }
  0xdf   : > { %v709_v3 = vrot.slane %v1745_v25, %v708_v46 }
  0xe0   : > { %v544_v8 = vadd.f32 %v512_v4, %v412_v63  ;;  %v545_v9 = vadd.f32 %v513_v5, %v413_v0  ;;  %v560_v10 = vadd.f32 %v528_v6, %v428_v1  ;;  %v561_v11 = vadd.f32 %v529_v7, %v429_v2  ;;  %v620_v12 = vpop.permute.xlu0 %619 }
  0xe1   : > { %v644_v13 = vmul.f32 %v620_v12, %v1800_v59  ;;  %v645_v14 = vmul.f32 %v620_v12, %v1802_v60  ;;  %v660_v15 = vmul.f32 %v620_v12, %v1804_v61  ;;  %v661_v16 = vmul.f32 %v620_v12, %v1806_v62 }
  0xe2   : > { %v1820_v17 = vpop.permute.xlu1 %607  ;;  %v705_v2 = vrot.slane %v1745_v25, %v704_v45  ;;  %v713_v4 = vrot.slane %v1760_v35, %v704_v45  ;;  %v717_v5 = vrot.slane %v1760_v35, %v708_v46  ;;  %v1876_v35 = vrot.slane %v709_v3, %v704_v45 }
  0xe3   : > { %2232 = vst [vmem:[#allocation9_spill] sm:$0xff] %v1820_v17  ;;  %v1822_v18 = vadd.f32 %v644_v13, %v544_v8  ;;  %v1824_v19 = vadd.f32 %v645_v14, %v545_v9  ;;  %v1826_v22 = vadd.f32 %v660_v15, %v560_v10  ;;  %v1828_v23 = vadd.f32 %v661_v16, %v561_v11 }
  0xe4   : > { %v1830_v27 = vpop.permute.xlu0 %635  ;;  %v1874_v14 = vrot.slane %v705_v2, %v704_v45  ;;  %v526_v46 = vmul.f32 %v1747_v26, %v1794_v56  ;;  %v508_v3 = vmul.f32 %v1753_v31, %v1766_v40  ;;  %v638_v21 = vmul.f32 %v1820_v17, %v1800_v59 }
  0xe5   : > { %2233 = vst [vmem:[#allocation10_spill] sm:$0xff] %v1822_v18  ;;  %2234 = vst [vmem:[#allocation11_spill] sm:$0xff] %v1824_v19  ;;  %v1834_v28 = vmul.f32 %v1830_v27, %v1800_v59  ;;  %v1838_v29 = vmul.f32 %v1830_v27, %v1802_v60 }
  0xe6   : > { %2235 = vst [vmem:[#allocation12_spill] sm:$0xff] %v1826_v22  ;;  %2236 = vst [vmem:[#allocation13_spill] sm:$0xff] %v1828_v23  ;;  %v639_v23 = vmul.f32 %v1820_v17, %v1802_v60 }
  0xe7   : > { %v389_v37 = vpop.permute.xlu1 %388 }
  0xe8   : > { %v414_v38 = vmul.f32 %v389_v37, %v1786_v52  ;;  %v415_v39 = vmul.f32 %v389_v37, %v1788_v53  ;;  %v430_v42 = vmul.f32 %v389_v37, %v1790_v54  ;;  %v431_v43 = vmul.f32 %v389_v37, %v1792_v55 }
  0xe9   : > { %v1850_v49 = vpop.permute.xlu0 %747  ;;  %v507_v37 = vmul.f32 %v1740_v24, %v1768_v41 }
  0xea   : > { %v1852_v50 = vadd.f32 %v514_v30, %v414_v38  ;;  %v1854_v51 = vadd.f32 %v515_v33, %v415_v39  ;;  %v1856_v32 = vadd.f32 %v530_v34, %v430_v42  ;;  %v1858_v63 = vadd.f32 %v531_v36, %v431_v43 }
  0xeb   : > { %v394_v0 = vpop.permute.xlu1 %393  ;;  %v506_v36 = vmul.f32 %v1740_v24, %v1766_v40  ;;  %v1892_v38 = vrot.slane %v713_v4, %v704_v45  ;;  %v1894_v39 = vrot.slane %v717_v5, %v704_v45  ;;  %v510_v42 = vmul.f32 %v1747_v26, %v1766_v40 }
  0xec   : > { %2237 = vst [vmem:[#allocation14_spill] sm:$0xff] %v1852_v50  ;;  %2238 = vst [vmem:[#allocation15_spill] sm:$0xff] %v1854_v51  ;;  %v416_v6 = vmul.f32 %v394_v0, %v1786_v52  ;;  %v417_v7 = vmul.f32 %v394_v0, %v1788_v53  ;;  %v432_v8 = vmul.f32 %v394_v0, %v1790_v54 }
  0xed   : > { %2239 = vst [vmem:[#allocation16_spill] sm:$0xff] %v1856_v32  ;;  %2240 = vst [vmem:[#allocation17_spill] sm:$0xff] %v1858_v63  ;;  %v1860_v1 = vpop.permute.xlu0 %767  ;;  %v433_v9 = vmul.f32 %v394_v0, %v1792_v55  ;;  %v511_v43 = vmul.f32 %v1747_v26, %v1768_v41  ;;  %v527_v0 = vmul.f32 %v1747_v26, %v1796_v57 }
  0xee   : > { %v509_v45 = vmul.f32 %v1753_v31, %v1768_v41  ;;  %v524_v4 = vmul.f32 %v1753_v31, %v1794_v56  ;;  %v525_v5 = vmul.f32 %v1753_v31, %v1796_v57  ;;  %v1920_v26 = vmul.f32 %v1772_v44, %v1796_v57 }
  0xef   : > { %v641_v31 = vmul.f32 %v1798_v58, %v1802_v60  ;;  %v1952_v63 = vmul.f32 %v1830_v27, %v1806_v62  ;;  %v790_v17 = vmul.f32 %v1850_v49, %v1892_v38 }
  0xf0   : > { %v496_v10 = vpop.permute.xlu1 %495 }
  0xf1   : > { %v516_v11 = vmul.f32 %v496_v10, %v1766_v40  ;;  %v517_v12 = vmul.f32 %v496_v10, %v1768_v41  ;;  %v532_v13 = vmul.f32 %v496_v10, %v1794_v56  ;;  %v533_v25 = vmul.f32 %v496_v10, %v1796_v57 }
  0xf2   : > { %v1878_v15 = vpop.permute.xlu0 %368  ;;  %v640_v10 = vmul.f32 %v1798_v58, %v1800_v59 }
  0xf3   : > { %v1880_v16 = vadd.f32 %v516_v11, %v416_v6  ;;  %v1882_v30 = vadd.f32 %v517_v12, %v417_v7  ;;  %v1884_v33 = vadd.f32 %v532_v13, %v432_v8  ;;  %v1886_v34 = vadd.f32 %v533_v25, %v433_v9 }
  0xf4   : > { %v1916_v7 = vmul.f32 %v1772_v44, %v1794_v56  ;;  %v406_v8 = vmul.f32 %v1878_v15, %v1786_v52  ;;  %v407_v9 = vmul.f32 %v1878_v15, %v1788_v53  ;;  %v656_v44 = vmul.f32 %v1798_v58, %v1804_v61 }
  0xf5   : > { %2241 = vst [vmem:[#allocation18_spill] sm:$0xff] %v1880_v16  ;;  %2242 = vst [vmem:[#allocation19_spill] sm:$0xff] %v1882_v30  ;;  %v1904_v2 = vpop.permute.xlu1 %615  ;;  %v657_v13 = vmul.f32 %v1798_v58, %v1806_v62 }
  0xf6   : > { %2243 = vst [vmem:[#allocation20_spill] sm:$0xff] %v1884_v33  ;;  %2244 = vst [vmem:[#allocation21_spill] sm:$0xff] %v1886_v34  ;;  %v374_v6 = vpop.permute.xlu0 %373  ;;  %v538_v33 = vadd.f32 %v506_v36, %v406_v8  ;;  %v539_v30 = vadd.f32 %v507_v37, %v407_v9 }
  0xf7   : > { %v408_v11 = vmul.f32 %v374_v6, %v1786_v52  ;;  %v409_v12 = vmul.f32 %v374_v6, %v1788_v53  ;;  %v424_v25 = vmul.f32 %v374_v6, %v1790_v54  ;;  %v425_v20 = vmul.f32 %v374_v6, %v1792_v55 }
  0xf8   : > { %v1948_v6 = vmul.f32 %v1830_v27, %v1804_v61 }
  0xf9   : > { %v540_v22 = vadd.f32 %v508_v3, %v408_v11  ;;  %v541_v19 = vadd.f32 %v509_v45, %v409_v12  ;;  %v774_v3 = vmul.f32 %v1850_v49, %v1874_v14  ;;  %v775_v45 = vmul.f32 %v1850_v49, %v1876_v35 }
  0xfa   : > { %v379_v18 = vpop.permute.xlu0 %378  ;;  %v1942_v34 = vpop.permute.xlu1 %739  ;;  %v556_v36 = vadd.f32 %v524_v4, %v424_v25  ;;  %v557_v37 = vadd.f32 %v525_v5, %v425_v20  ;;  %v670_v5 = vadd.f32 %v638_v21, %v538_v33  ;;  %v671_v25 = vadd.f32 %v639_v23, %v539_v30 }
  0xfb   : > { %2245 = vst [vmem:[#allocation22_spill] sm:$0xff] %v1942_v34  ;;  %v410_v16 = vmul.f32 %v379_v18, %v1786_v52  ;;  %v411_v58 = vmul.f32 %v379_v18, %v1788_v53  ;;  %v770_v8 = vmul.f32 %v1942_v34, %v1874_v14  ;;  %v771_v9 = vmul.f32 %v1942_v34, %v1876_v35 }
  0xfc   : > { %v426_v11 = vmul.f32 %v379_v18, %v1790_v54  ;;  %v427_v12 = vmul.f32 %v379_v18, %v1792_v55  ;;  %v1968_v51 = vadd.f32 %v640_v10, %v540_v22  ;;  %v1970_v50 = vadd.f32 %v641_v31, %v541_v19 }
  0xfd   : > { %v542_v4 = vadd.f32 %v510_v42, %v410_v16  ;;  %v543_v20 = vadd.f32 %v511_v43, %v411_v58  ;;  %v791_v34 = vmul.f32 %v1850_v49, %v1894_v39  ;;  %v642_v18 = vmul.f32 %v1904_v2, %v1800_v59 }
  0xfe   : > { %v1964_v27 = vpop.permute.xlu0 %398  ;;  %v1966_v32 = vpop.permute.xlu1 %743  ;;  %v802_v22 = vadd.f32 %v770_v8, %v670_v5  ;;  %v803_v10 = vadd.f32 %v771_v9, %v671_v25  ;;  %v1980_v19 = vadd.f32 %v656_v44, %v556_v36  ;;  %v1982_v16 = vadd.f32 %v657_v13, %v557_v37 }
  0xff   : > { %2246 = vst [vmem:[#allocation23_spill] sm:$0xff] %v1966_v32  ;;  %v643_v32 = vmul.f32 %v1904_v2, %v1802_v60  ;;  %v784_v21 = vmul.f32 %v1860_v1, %v1874_v14  ;;  %v785_v23 = vmul.f32 %v1860_v1, %v1876_v35  ;;  %v558_v30 = vadd.f32 %v526_v46, %v426_v11 }
 0x100   : > { %v559_v49 = vadd.f32 %v527_v0, %v427_v12  ;;  %v674_v58 = vadd.f32 %v642_v18, %v542_v4  ;;  %v658_v46 = vmul.f32 %v1904_v2, %v1804_v61  ;;  %v659_v0 = vmul.f32 %v1904_v2, %v1806_v62 }
 0x101   : > { %v675_v44 = vadd.f32 %v643_v32, %v543_v20  ;;  %v418_v12 = vmul.f32 %v1964_v27, %v1786_v52  ;;  %v419_v32 = vmul.f32 %v1964_v27, %v1788_v53 }
 0x102   : > { %v1988_v33 = vpop.permute.xlu0 %844  ;;  %v2010_v2 = vadd.f32 %v774_v3, %v674_v58 }
 0x103   : > { %v404_v42 = vpop.permute.xlu1 %403  ;;  %v882_v43 = vadd.f32 %v1988_v33, %v802_v22  ;;  %v883_v31 = vadd.f32 %v1988_v33, %v803_v10 }
 0x104   : > { %v420_v13 = vmul.f32 %v404_v42, %v1786_v52  ;;  %v421_v36 = vmul.f32 %v404_v42, %v1788_v53  ;;  %v436_v37 = vmul.f32 %v404_v42, %v1790_v54  ;;  %v437_v8 = vmul.f32 %v404_v42, %v1792_v55 }
 0x105   : > { %v914_v9 = vmax.f32 %v882_v43, 0.0  ;;  %v915_v11 = vmax.f32 %v883_v31, 0.0  ;;  %v2014_v42 = vadd.f32 %v775_v45, %v675_v44  ;;  %v690_v52 = vadd.f32 %v658_v46, %v558_v30 }
 0x106   : > { %v552_v4 = vadd.f32 %v1778_v47, %v420_v13  ;;  %v553_v20 = vadd.f32 %v1782_v48, %v421_v36  ;;  %v2006_v5 = vpop.permute.xlu0 %864  ;;  %v568_v25 = vadd.f32 %v1916_v7, %v436_v37  ;;  %v569_v18 = vadd.f32 %v1920_v26, %v437_v8 }
 0x107   : > { %v946_v22 = vadd.f32 %v915_v11, %v914_v9  ;;  %v691_v43 = vadd.f32 %v659_v0, %v559_v49  ;;  %v2021_v7 = vadd.f32 %v790_v17, %v690_v52  ;;  %v800_v45 = vmul.f32 %v1860_v1, %v1892_v38 }
 0x108   : > { %v2012_v10 = vpop.permute.xlu1 %499  ;;  %v684_v53 = vadd.f32 %v1834_v28, %v552_v4  ;;  %v685_v3 = vadd.f32 %v1838_v29, %v553_v20  ;;  %v801_v30 = vmul.f32 %v1860_v1, %v1894_v39  ;;  %v701_v17 = vadd.f32 %v1952_v63, %v569_v18 }
 0x109   : > { %v518_v47 = vmul.f32 %v2012_v10, %v1766_v40  ;;  %v519_v48 = vmul.f32 %v2012_v10, %v1768_v41  ;;  %947 = vadd.xlane.f32.xlu1 %v946_v22  ;;  %v2023_v26 = vadd.f32 %v791_v34, %v691_v43  ;;  %v700_v41 = vadd.f32 %v1948_v6, %v568_v25 }
 0x10a   : > { %v880_v31 = vpop.permute.xlu0 %879  ;;  %v816_v40 = vadd.f32 %v784_v21, %v684_v53  ;;  %v817_v58 = vadd.f32 %v785_v23, %v685_v3  ;;  %v833_v29 = vadd.f32 %v801_v30, %v701_v17  ;;  %v422_v63 = vmul.f32 %v1878_v15, %v1790_v54 }
 0x10b   : > { %v550_v28 = vadd.f32 %v518_v47, %v418_v12  ;;  %v551_v49 = vadd.f32 %v519_v48, %v419_v32  ;;  %v832_v36 = vadd.f32 %v800_v45, %v700_v41  ;;  %v522_v12 = vmul.f32 %v1740_v24, %v1794_v56  ;;  %v2247_v47 = vld [vmem:[#allocation9_spill] sm:$0xff]  ;;  %v2249_v41 = vld [vmem:[#allocation23_spill] sm:$0xff] }
 0x10c   : > { %v896_v34 = vadd.f32 %v880_v31, %v816_v40  ;;  %v897_v13 = vadd.f32 %v880_v31, %v817_v58  ;;  %v913_v1 = vadd.f32 %v880_v31, %v833_v29  ;;  %v423_v32 = vmul.f32 %v1878_v15, %v1792_v55 }
 0x10d   : > { %v624_v44 = vpop.permute.xlu1 %623  ;;  %v912_v0 = vadd.f32 %v880_v31, %v832_v36  ;;  %v523_v4 = vmul.f32 %v1740_v24, %v1796_v57  ;;  %v554_v20 = vadd.f32 %v522_v12, %v422_v63  ;;  %v654_v24 = vmul.f32 %v2247_v47, %v1804_v61  ;;  %v2248_v31 = vld [vmem:[#allocation22_spill] sm:$0xff]  ;;  %v2251_v36 = vld [vmem:[#allocation15_spill] sm:$0xff] }
 0x10e   : > { %v928_v8 = vmax.f32 %v896_v34, 0.0  ;;  %v929_v46 = vmax.f32 %v897_v13, 0.0  ;;  %v945_v21 = vmax.f32 %v913_v1, 0.0  ;;  %v646_v25 = vmul.f32 %v624_v44, %v1800_v59  ;;  %v2250_v34 = vld [vmem:[#allocation14_spill] sm:$0xff] }
 0x10f   : > { %v944_v11 = vmax.f32 %v912_v0, 0.0  ;;  %v647_v18 = vmul.f32 %v624_v44, %v1802_v60  ;;  %v662_v52 = vmul.f32 %v624_v44, %v1804_v61  ;;  %v663_v43 = vmul.f32 %v624_v44, %v1806_v62 }
 0x110   : > { %v2034_v9 = vadd.f32 %v929_v46, %v928_v8  ;;  %v655_v48 = vmul.f32 %v2247_v47, %v1806_v62  ;;  %v555_v3 = vadd.f32 %v523_v4, %v423_v32  ;;  %v786_v40 = vmul.f32 %v2248_v31, %v1892_v38  ;;  %v2252_v8 = vld [vmem:[#allocation16_spill] sm:$0xff] }
 0x111   : > { %v2032_v37 = vpop.permute.xlu1 %627  ;;  %v2036_v23 = vadd.f32 %v945_v21, %v944_v11  ;;  %v787_v58 = vmul.f32 %v2248_v31, %v1894_v39  ;;  %v772_v17 = vmul.f32 %v2249_v41, %v1874_v14  ;;  %v686_v44 = vadd.f32 %v654_v24, %v554_v20 }
 0x112   : > { %v678_v13 = vadd.f32 %v646_v25, %v2250_v34  ;;  %v679_v29 = vadd.f32 %v647_v18, %v2251_v36  ;;  %v694_v46 = vadd.f32 %v662_v52, %v2252_v8  ;;  %v773_v12 = vmul.f32 %v2249_v41, %v1876_v35 }
 0x113   : > { %v788_v32 = vmul.f32 %v2249_v41, %v1892_v38  ;;  %v789_v4 = vmul.f32 %v2249_v41, %v1894_v39  ;;  %v687_v20 = vadd.f32 %v655_v48, %v555_v3  ;;  %v818_v47 = vadd.f32 %v786_v40, %v686_v44 }
 0x114   : > { %v805_v48 = vadd.f32 %v773_v12, %v1970_v50 }
 0x115   : > { %v819_v24 = vadd.f32 %v787_v58, %v687_v20  ;;  %v820_v3 = vadd.f32 %v788_v32, %v1980_v19  ;;  %v821_v41 = vadd.f32 %v789_v4, %v1982_v16  ;;  %v435_v19 = vmul.f32 %v1964_v27, %v1792_v55 }
 0x116   : > { %v2038_v6 = vpop.permute.xlu1 %751  ;;  %v648_v32 = vmul.f32 %v2032_v37, %v1800_v59  ;;  %v649_v55 = vmul.f32 %v2032_v37, %v1802_v60 }
 0x11b   : > { %v2050_v22 = vpop.permute.xlu1 %631 }
 0x11c   : > { %v650_v53 = vmul.f32 %v2050_v22, %v1800_v59  ;;  %v651_v15 = vmul.f32 %v2050_v22, %v1802_v60  ;;  %v792_v60 = vmul.f32 %v2038_v6, %v1892_v38 }
 0x11e   : > { %v2062_v45 = vadd.f32 %v650_v53, %v550_v28  ;;  %v2064_v30 = vadd.f32 %v651_v15, %v551_v49  ;;  %v2253_v28 = vld [vmem:[#allocation17_spill] sm:$0xff]  ;;  %v804_v15 = vadd.f32 %v772_v17, %v1968_v51  ;;  %v434_v17 = vmul.f32 %v1964_v27, %v1790_v54 }
 0x11f   : > { %v695_v0 = vadd.f32 %v663_v43, %v2253_v28  ;;  %v534_v54 = vmul.f32 %v2012_v10, %v1794_v56  ;;  %v664_v27 = vmul.f32 %v2032_v37, %v1804_v61  ;;  %v776_v56 = vmul.f32 %v2038_v6, %v1874_v14 }
 0x120   : > { %v756_v49 = vpop.permute.xlu1 %755 }
 0x121   : > { %v778_v1 = vmul.f32 %v756_v49, %v1874_v14  ;;  %v779_v11 = vmul.f32 %v756_v49, %v1876_v35  ;;  %v794_v21 = vmul.f32 %v756_v49, %v1892_v38  ;;  %v795_v63 = vmul.f32 %v756_v49, %v1894_v39 }
 0x122   : > { %v2122_v59 = vadd.f32 %v534_v54, %v434_v17 }
 0x123   : > { %v810_v25 = vadd.f32 %v778_v1, %v678_v13  ;;  %v811_v18 = vadd.f32 %v779_v11, %v679_v29  ;;  %v826_v52 = vadd.f32 %v794_v21, %v694_v46  ;;  %v827_v43 = vadd.f32 %v795_v63, %v695_v0 }
 0x124   : > { %v2086_v53 = vpop.permute.xlu1 %759  ;;  %v898_v13 = vadd.f32 %v1988_v33, %v818_v47  ;;  %v899_v46 = vadd.f32 %v1988_v33, %v819_v24  ;;  %v535_v33 = vmul.f32 %v2012_v10, %v1796_v57  ;;  %v777_v57 = vmul.f32 %v2038_v6, %v1876_v35  ;;  %v2254_v47 = vld [vmem:[#allocation18_spill] sm:$0xff]  ;;  %v2255_v24 = vld [vmem:[#allocation19_spill] sm:$0xff] }
 0x125   : > { %v890_v31 = vadd.f32 %v2006_v5, %v810_v25  ;;  %v891_v34 = vadd.f32 %v2006_v5, %v811_v18  ;;  %v906_v36 = vadd.f32 %v2006_v5, %v826_v52  ;;  %v907_v8 = vadd.f32 %v2006_v5, %v827_v43 }
 0x126   : > { %v930_v16 = vmax.f32 %v898_v13, 0.0  ;;  %v931_v4 = vmax.f32 %v899_v46, 0.0  ;;  %v665_v52 = vmul.f32 %v2032_v37, %v1806_v62  ;;  %v793_v10 = vmul.f32 %v2038_v6, %v1894_v39  ;;  %v2258_v13 = vld [vmem:[#allocation10_spill] sm:$0xff] }
 0x127   : > { %v922_v29 = vmax.f32 %v890_v31, 0.0  ;;  %v923_v51 = vmax.f32 %v891_v34, 0.0  ;;  %v938_v40 = vmax.f32 %v906_v36, 0.0  ;;  %v939_v58 = vmax.f32 %v907_v8, 0.0  ;;  %v2256_v34 = vld [vmem:[#allocation20_spill] sm:$0xff]  ;;  %v2257_v8 = vld [vmem:[#allocation21_spill] sm:$0xff] }
 0x128   : > { %v970_v43 = vadd.f32 %v931_v4, %v930_v16  ;;  %v680_v37 = vadd.f32 %v648_v32, %v2254_v47  ;;  %v681_v31 = vadd.f32 %v649_v55, %v2255_v24  ;;  %v696_v36 = vadd.f32 %v664_v27, %v2256_v34 }
 0x129   : > { %v850_v44 = vpop.permute.xlu1 %849  ;;  %v2102_v49 = vadd.f32 %v923_v51, %v922_v29  ;;  %v2104_v1 = vadd.f32 %v939_v58, %v938_v40  ;;  %v808_v29 = vadd.f32 %v776_v56, %v2258_v13  ;;  %v2259_v51 = vld [vmem:[#allocation11_spill] sm:$0xff]  ;;  %v781_v46 = vmul.f32 %v2086_v53, %v1876_v35 }
 0x12a   : > { %v884_v28 = vadd.f32 %v850_v44, %v804_v15  ;;  %v885_v5 = vadd.f32 %v850_v44, %v805_v48  ;;  %v900_v0 = vadd.f32 %v850_v44, %v820_v3  ;;  %v901_v50 = vadd.f32 %v850_v44, %v821_v41 }
 0x12b   : > { %v567_v15 = vadd.f32 %v535_v33, %v435_v19  ;;  %v697_v48 = vadd.f32 %v665_v52, %v2257_v8  ;;  %v780_v3 = vmul.f32 %v2086_v53, %v1874_v14  ;;  %v809_v40 = vadd.f32 %v777_v57, %v2259_v51 }
 0x12c   : > { %v916_v11 = vmax.f32 %v884_v28, 0.0  ;;  %v917_v21 = vmax.f32 %v885_v5, 0.0  ;;  %v932_v63 = vmax.f32 %v900_v0, 0.0  ;;  %v933_v12 = vmax.f32 %v901_v50, 0.0  ;;  %v2260_v5 = vld [vmem:[#allocation12_spill] sm:$0xff]  ;;  %v2261_v50 = vld [vmem:[#allocation13_spill] sm:$0xff] }
 0x12d   : > { %v796_v28 = vmul.f32 %v2086_v53, %v1892_v38  ;;  %v824_v0 = vadd.f32 %v792_v60, %v2260_v5  ;;  %v825_v19 = vadd.f32 %v793_v10, %v2261_v50  ;;  %v1533_v5 = vmov 0.0   ;;  %v1020_v50 = vld [vmem:[%s309_s12 + $0x10] sm:$0xff] }
 0x12e   : > { %v764_v20 = vpop.permute.xlu1 %763  ;;  %v949_v25 = vadd.f32 %v917_v21, %v916_v11  ;;  %v973_v18 = vadd.f32 %v933_v12, %v932_v63  ;;  %v812_v12 = vadd.f32 %v780_v3, %v680_v37  ;;  %1340 = vmatprep.subr.bf16.mxu0 %v1533_v5  ;;  %1348 = vmatprep.mubr.msk.bf16.mxu0 %vm1534_vm0, %v1533_v5 }
 0x12f   : > { %v782_v55 = vmul.f32 %v764_v20, %v1874_v14  ;;  %v783_v52 = vmul.f32 %v764_v20, %v1876_v35  ;;  %v799_v14 = vmul.f32 %v764_v20, %v1894_v39 }
 0x130   : > { %950 = vadd.xlane.f32.xlu0 %v949_v25  ;;  %974 = vadd.xlane.f32.xlu1 %v973_v18  ;;  %v813_v18 = vadd.f32 %v781_v46, %v681_v31 }
 0x131   : > { %v814_v31 = vadd.f32 %v782_v55, %v2062_v45 }
 0x133   : > { %v855_v41 = vpop.permute.xlu1 %854 }
 0x134   : > { %971 = vadd.xlane.f32.xlu0 %v970_v43  ;;  %v886_v6 = vadd.f32 %v855_v41, %v2010_v2  ;;  %v887_v58 = vadd.f32 %v855_v41, %v2014_v42  ;;  %v902_v17 = vadd.f32 %v855_v41, %v2021_v7  ;;  %v903_v44 = vadd.f32 %v855_v41, %v2023_v26 }
 0x135   : > { %v666_v42 = vmul.f32 %v2050_v22, %v1804_v61  ;;  %v667_v7 = vmul.f32 %v2050_v22, %v1806_v62  ;;  %v797_v26 = vmul.f32 %v2086_v53, %v1894_v39  ;;  %v828_v62 = vadd.f32 %v796_v28, %v696_v36 }
 0x136   : > { %v918_v16 = vmax.f32 %v886_v6, 0.0  ;;  %v919_v11 = vmax.f32 %v887_v58, 0.0  ;;  %v934_v21 = vmax.f32 %v902_v17, 0.0  ;;  %v935_v2 = vmax.f32 %v903_v44, 0.0 }
 0x137   : > { %v860_v63 = vpop.permute.xlu1 %859  ;;  %v798_v22 = vmul.f32 %v764_v20, %v1892_v38  ;;  %v829_v10 = vadd.f32 %v797_v26, %v697_v48  ;;  %v815_v38 = vadd.f32 %v783_v52, %v2064_v30  ;;  %v698_v41 = vadd.f32 %v666_v42, %v2122_v59 }
 0x138   : > { %v952_v54 = vadd.f32 %v919_v11, %v918_v16  ;;  %v976_v33 = vadd.f32 %v935_v2, %v934_v21  ;;  %v888_v32 = vadd.f32 %v860_v63, %v808_v29  ;;  %v889_v4 = vadd.f32 %v860_v63, %v809_v40  ;;  %v1023_v16 = vld [vmem:[%s309_s12 + $0x28] sm:$0xff]  ;;  %v1024_v21 = vld [vmem:[%s309_s12 + $0x30] sm:$0xff]  ;;  %v1025_v2 = vld [vmem:[%s309_s12 + $0x38] sm:$0xff] }
 0x139   : > { %v904_v27 = vadd.f32 %v860_v63, %v824_v0  ;;  %v905_v25 = vadd.f32 %v860_v63, %v825_v19  ;;  %v699_v29 = vadd.f32 %v667_v7, %v567_v15  ;;  %v830_v58 = vadd.f32 %v798_v22, %v698_v41  ;;  %v1022_v19 = vld [vmem:[%s309_s12 + $0x20] sm:$0xff] }
 0x13a   : > { %953 = vadd.xlane.f32.xlu0 %v952_v54  ;;  %v920_v61 = vmax.f32 %v888_v32, 0.0  ;;  %v921_v56 = vmax.f32 %v889_v4, 0.0  ;;  %v1028_v11 = vpack.c.bf16 %v1023_v16, %v1022_v19  ;;  %v1029_v42 = vpack.c.bf16 %v1025_v2, %v1024_v21 }
 0x13b   : > { %v870_v53 = vpop.permute.xlu1 %869  ;;  %v936_v57 = vmax.f32 %v904_v27, 0.0  ;;  %v937_v60 = vmax.f32 %v905_v25, 0.0  ;;  %v831_v17 = vadd.f32 %v799_v14, %v699_v29  ;;  %v2262_v4 = vlaneseq }
 0x13c   : > { %v955_v43 = vadd.f32 %v921_v56, %v920_v61  ;;  %v892_v47 = vadd.f32 %v870_v53, %v812_v12  ;;  %v893_v37 = vadd.f32 %v870_v53, %v813_v18  ;;  %v908_v24 = vadd.f32 %v870_v53, %v828_v62 }
 0x13d   : > { %v979_v34 = vadd.f32 %v937_v60, %v936_v57  ;;  %v909_v35 = vadd.f32 %v870_v53, %v829_v10  ;;  %v1062_v55 = vand.u32 127, %v2262_v4 }
 0x13e   : > { %977 = vadd.xlane.f32.xlu0 %v976_v33  ;;  %956 = vadd.xlane.f32.xlu1 %v955_v43  ;;  %v924_v8 = vmax.f32 %v892_v47, 0.0  ;;  %v925_v36 = vmax.f32 %v893_v37, 0.0  ;;  %v940_v3 = vmax.f32 %v908_v24, 0.0 }
 0x13f   : > { %v875_v48 = vpop.permute.xlu1 %874  ;;  %v941_v13 = vmax.f32 %v909_v35, 0.0  ;;  %v1067_v22 = vadd.s32 4294967288, %v1062_v55  ;;  %v1074_v47 = vadd.s32 4294967280, %v1062_v55  ;;  %v1081_v24 = vadd.s32 4294967272, %v1062_v55  ;;  %v2263_v35 = vld [vmem:[#allocation8_spill] sm:$0xff] }
 0x140   : > { %v961_v51 = vadd.f32 %v925_v36, %v924_v8  ;;  %v894_v40 = vadd.f32 %v875_v48, %v814_v31  ;;  %v895_v6 = vadd.f32 %v875_v48, %v815_v38  ;;  %v910_v44 = vadd.f32 %v875_v48, %v830_v58 }
 0x141   : > { %v985_v39 = vadd.f32 %v941_v13, %v940_v3  ;;  %v911_v46 = vadd.f32 %v875_v48, %v831_v17  ;;  %v1065_v8 = vsub.s32 %v1062_v55, %v2263_v35  ;;  %v1070_v36 = vsub.s32 %v1067_v22, %v2263_v35 }
 0x142   : > { %959 = vadd.xlane.f32.xlu0 %v2102_v49  ;;  %980 = vadd.xlane.f32.xlu1 %v979_v34  ;;  %v926_v45 = vmax.f32 %v894_v40, 0.0  ;;  %v927_v20 = vmax.f32 %v895_v6, 0.0  ;;  %v942_v59 = vmax.f32 %v910_v44, 0.0  ;;  %v1018_v49 = vld [vmem:[%s309_s12] sm:$0xff]  ;;  %v1088_v3 = vadd.s32 4294967264, %v1062_v55 }
 0x143   : > { %v943_v15 = vmax.f32 %v911_v46, 0.0  ;;  %v1077_v40 = vsub.s32 %v1074_v47, %v2263_v35 }
 0x144   : > { %v964_v30 = vadd.f32 %v927_v20, %v926_v45  ;;  %v1095_v20 = vadd.s32 4294967256, %v1062_v55  ;;  %v1091_v46 = vsub.s32 %v1088_v3, %v2263_v35 }
 0x145   : > { %v988_v28 = vadd.f32 %v943_v15, %v942_v59  ;;  %v1102_v15 = vadd.s32 4294967248, %v1062_v55 }
 0x146   : > { %983 = vadd.xlane.f32.xlu0 %v2104_v1  ;;  %962 = vadd.xlane.f32.xlu1 %v961_v51  ;;  %v1019_v1 = vld [vmem:[%s309_s12 + $0x8] sm:$0xff] }
 0x147   : > { %v1026_v0 = vpack.c.bf16 %v1019_v1, %v1018_v49 }
 0x149   : > { %1341 = vmatpush3.bf16.msra.mxu0 %v1026_v0 }
 0x14a   : > { %965 = vadd.xlane.f32.xlu0 %v964_v30  ;;  %986 = vadd.xlane.f32.xlu1 %v985_v39  ;;  %v1084_v39 = vsub.s32 %v1081_v24, %v2263_v35 }
 0x14b   : > { %1342 = vmatprep.subr.bf16.mxu0 %v1533_v5 }
 0x14e   : > { %989 = vadd.xlane.f32.xlu0 %v988_v28  ;;  %968 = vadd.xlane.f32.xlu1 %v2034_v9  ;;  %v1021_v9 = vld [vmem:[%s309_s12 + $0x18] sm:$0xff] }
 0x152   : > { %992 = vadd.xlane.f32.xlu1 %v2036_v23  ;;  %v1027_v23 = vpack.c.bf16 %v1021_v9, %v1020_v50 }
 0x154   : > { %1343 = vmatpush3.bf16.msra.mxu0 %v1027_v23 }
 0x155   : > { %1344 = vmatprep.subr.bf16.mxu0 %v1533_v5 }
 0x158   : > { %1345 = vmatpush3.bf16.msra.mxu0 %v1028_v11  ;;  %v1098_v11 = vsub.s32 %v1095_v20, %v2263_v35  ;;  %v1328_v20 = vld [vmem:[%s312_s29] ss:$0 sm:$0xff] }
 0x159   : > { %1346 = vmatprep.subr.bf16.mxu0 %v1533_v5 }
 0x15c   : > { %1347 = vmatpush3.bf16.msra.mxu0 %v1029_v42 }
 0x196   : > { %v948_v26 = vpop.xlane.xlu1 %947 }
 0x197   : > { %v994_v18 = vmul.f32 0.00390625, %v948_v26 }
 0x1bd   : > { %v951_v7 = vpop.xlane.xlu0 %950  ;;  %v975_v12 = vpop.xlane.xlu1 %974 }
 0x1be   : > { %v995_v27 = vmul.f32 0.00390625, %v951_v7  ;;  %v1003_v61 = vmul.f32 0.00390625, %v975_v12  ;;  %v1109_v7 = vadd.s32 4294967240, %v1062_v55 }
 0x1c0   : > { %v1010_v53 = vpack.c.bf16 %v995_v27, %v994_v18 }
 0x1c1   : > { %v972_v63 = vpop.xlane.xlu0 %971 }
 0x1c2   : > { %v1002_v25 = vmul.f32 0.00390625, %v972_v63  ;;  %v1045_v38 = vunpack.c.l.b16 %v1010_v53  ;;  %v1046_v41 = vunpack.c.h.b16 %v1010_v53 }
 0x1c4   : > { %v1014_v10 = vpack.c.bf16 %v1003_v61, %v1002_v25  ;;  %v1066_v28 = vrot.slane %v1045_v38, %v1065_v8  ;;  %v1071_v49 = vrot.slane %v1046_v41, %v1070_v36 }
 0x1c6   : > { %v1053_v48 = vunpack.c.l.b16 %v1014_v10  ;;  %v1054_v51 = vunpack.c.h.b16 %v1014_v10  ;;  %v1073_v63 = vsel %vm1072_vm1, %v1071_v49, %v1066_v28 }
 0x1c7   : > { %v954_v54 = vpop.xlane.xlu0 %953 }
 0x1c8   : > { %v996_v57 = vmul.f32 0.00390625, %v954_v54  ;;  %v1119_v1 = vrot.slane %v1053_v48, %v1065_v8  ;;  %v1123_v0 = vrot.slane %v1054_v51, %v1070_v36 }
 0x1ca   : > { %v1124_v4 = vsel %vm1072_vm1, %v1123_v0, %v1119_v1 }
 0x1cb   : > { %v978_v33 = vpop.xlane.xlu0 %977  ;;  %v957_v32 = vpop.xlane.xlu1 %956 }
 0x1cc   : > { %v997_v52 = vmul.f32 0.00390625, %v957_v32  ;;  %v1004_v43 = vmul.f32 0.00390625, %v978_v33  ;;  %v1105_v32 = vsub.s32 %v1102_v15, %v2263_v35 }
 0x1ce   : > { %v1011_v37 = vpack.c.bf16 %v997_v52, %v996_v57 }
 0x1cf   : > { %v960_v56 = vpop.xlane.xlu0 %959  ;;  %v981_v62 = vpop.xlane.xlu1 %980 }
 0x1d0   : > { %v1005_v60 = vmul.f32 0.00390625, %v981_v62  ;;  %v998_v13 = vmul.f32 0.00390625, %v960_v56  ;;  %v1047_v6 = vunpack.c.l.b16 %v1011_v37  ;;  %v1048_v5 = vunpack.c.h.b16 %v1011_v37 }
 0x1d2   : > { %v1015_v14 = vpack.c.bf16 %v1005_v60, %v1004_v43  ;;  %v1078_v50 = vrot.slane %v1047_v6, %v1077_v40  ;;  %v1085_v12 = vrot.slane %v1048_v5, %v1084_v39  ;;  %v1112_v43 = vsub.s32 %v1109_v7, %v2263_v35 }
 0x1d3   : > { %v984_v34 = vpop.xlane.xlu0 %983  ;;  %v963_v31 = vpop.xlane.xlu1 %962 }
 0x1d4   : > { %v999_v29 = vmul.f32 0.00390625, %v963_v31  ;;  %v1055_v45 = vunpack.c.l.b16 %v1015_v14  ;;  %v1006_v44 = vmul.f32 0.00390625, %v984_v34  ;;  %v1056_v23 = vunpack.c.h.b16 %v1015_v14 }
 0x1d5   : > { %v1080_v27 = vsel %vm1079_vm2, %v1078_v50, %v1073_v63 }
 0x1d6   : > { %v1012_v58 = vpack.c.bf16 %v999_v29, %v998_v13  ;;  %v1128_v16 = vrot.slane %v1055_v45, %v1077_v40  ;;  %v1133_v61 = vrot.slane %v1056_v23, %v1084_v39  ;;  %v1087_v60 = vsel %vm1086_vm3, %v1085_v12, %v1080_v27 }
 0x1d7   : > { %v966_v17 = vpop.xlane.xlu0 %965  ;;  %v987_v30 = vpop.xlane.xlu1 %986 }
 0x1d8   : > { %v1007_v59 = vmul.f32 0.00390625, %v987_v30  ;;  %v1049_v9 = vunpack.c.l.b16 %v1012_v58  ;;  %v1000_v2 = vmul.f32 0.00390625, %v966_v17  ;;  %v1050_v54 = vunpack.c.h.b16 %v1012_v58 }
 0x1d9   : > { %v1129_v52 = vsel %vm1079_vm2, %v1128_v16, %v1124_v4 }
 0x1da   : > { %v1016_v19 = vpack.c.bf16 %v1007_v59, %v1006_v44  ;;  %v1092_v25 = vrot.slane %v1049_v9, %v1091_v46  ;;  %v1099_v10 = vrot.slane %v1050_v54, %v1098_v11  ;;  %v1134_v34 = vsel %vm1086_vm3, %v1133_v61, %v1129_v52 }
 0x1db   : > { %v969_v21 = vpop.xlane.xlu1 %968  ;;  %v990_v33 = vpop.xlane.xlu0 %989 }
 0x1dc   : > { %v1057_v42 = vunpack.c.l.b16 %v1016_v19  ;;  %v1001_v26 = vmul.f32 0.00390625, %v969_v21  ;;  %v1058_v56 = vunpack.c.h.b16 %v1016_v19  ;;  %v1008_v22 = vmul.f32 0.00390625, %v990_v33 }
 0x1dd   : > { %v1094_v37 = vsel %vm1093_vm4, %v1092_v25, %v1087_v60 }
 0x1de   : > { %v1013_v18 = vpack.c.bf16 %v1001_v26, %v1000_v2  ;;  %v1138_v62 = vrot.slane %v1057_v42, %v1091_v46  ;;  %v1143_v31 = vrot.slane %v1058_v56, %v1098_v11  ;;  %v1101_v3 = vsel %vm1100_vm5, %v1099_v10, %v1094_v37 }
 0x1df   : > { %v993_v55 = vpop.xlane.xlu1 %992 }
 0x1e0   : > { %v1051_v53 = vunpack.c.l.b16 %v1013_v18  ;;  %v1009_v57 = vmul.f32 0.00390625, %v993_v55  ;;  %v1052_v47 = vunpack.c.h.b16 %v1013_v18  ;;  %v1139_v8 = vsel %vm1093_vm4, %v1138_v62, %v1134_v34 }
 0x1e1   : > { %v1144_v29 = vsel %vm1100_vm5, %v1143_v31, %v1139_v8 }
 0x1e2   : > { %v1106_v24 = vrot.slane %v1051_v53, %v1105_v32  ;;  %v1017_v14 = vpack.c.bf16 %v1009_v57, %v1008_v22  ;;  %v1113_v41 = vrot.slane %v1052_v47, %v1112_v43 }
 0x1e4   : > { %v1059_v36 = vunpack.c.l.b16 %v1017_v14  ;;  %v1060_v38 = vunpack.c.h.b16 %v1017_v14  ;;  %v1108_v35 = vsel %vm1107_vm6, %v1106_v24, %v1101_v3 }
 0x1e5   : > { %v1115_v40 = vsel %vm1114_vm7, %v1113_v41, %v1108_v35 }
 0x1e6   : > { %v1148_v48 = vrot.slane %v1059_v36, %v1105_v32  ;;  %v1153_v13 = vrot.slane %v1060_v38, %v1112_v43 }
 0x1e8   : > { %v1149_v51 = vsel %vm1107_vm6, %v1148_v48, %v1144_v29 }
 0x1e9   : > { %v1154_v6 = vsel %vm1114_vm7, %v1153_v13, %v1149_v51 }
 0x1ea   : > { %v1156_v39 = vsel %vm1155_vm8, %v1154_v6, %v1115_v40 }
 0x1eb   : > { %v1157_v45 = vpack.c.b16 %v1156_v39, %v1156_v39 }
 0x1ed   : > { %1349 = vmatmul.mubr.msk.bf16.vlgmr.msra.gmra.mrb[0].mxu0 %vm1158_vm9, %v1157_v45 }
 0x2c0   : > { %v1196_v58 = vpop.f32.mrb[0].mxu0 }
 0x2c1   : > { %v1197_v17 = vadd.f32 %v1328_v20, %v1196_v58  ;;  %v1350_v30 = vpop.f32.mrb[1].mxu0 }
 0x2c2   : > { %v1199_v44 = vpop.f32.mrb[2].mxu0 }
 0x2c3   : > { %1203 = vst.msk [vmem:[%s316_s18] sm:$0x3] %vm1202_vm10, %v1197_v17  ;;  %v1351_v46 = vpop.f32.mrb[3].mxu0 }
 0x2c4 PF: > { %p18_p11 = scmp.ge.s32.totalorder %s1587_s23, 4   ;;  %s2264_s18 = smov %s1515_s19 }
 0x2c5   : > { %s2265_s19 = smov %s1519_s20  ;;  %s2266_s20 = smov %s1597_s26 }
 0x2c6   : > { %s2267_s21 = smov %s1587_s23  ;;  %20 = sbr.rel (!%p18_p11) target bundleno = 5 (0x5), region = 99 }
 0x2cd   :  { %1223 = vsyncpa [#allocation3], 1 }
 0x2ce   :  { %1225 = vsyncpa [#allocation3 + $0x1], 1 }
 0x2cf   :  { %1226 = vsyncpa [#allocation5], 1 }
 0x2d0   :  { %1228 = vsyncpa [#allocation5 + $0x1], 1 }

</bundles_post_ra>
